<compile_context>
chip_gen: v7x
topology: tpu7x:2x2x1
jax: 0.10.0
libtpu: 0.0.40
codegen_flags: <defaults>
</compile_context>

<pallas_src>
import math

import jax
import jax.numpy as jnp
from jax.experimental import pallas as pl
from jax.experimental.pallas import tpu as pltpu


def bbox_pe_kernel(bbox_ref, s_ref, out_ref):
    # bbox_ref : (TR, 4k+1)        packed bbox coords + ones column
    # s_ref    : (4k+1, k*size)    selection/scale matrix + phase row (resident)
    # out_ref  : (TR, k*size)      lane-dense packed positional encodings
    arg = jnp.dot(bbox_ref[...], s_ref[...], preferred_element_type=jnp.float32)
    out_ref[...] = jnp.sin(arg)


def bbox_positional_encoding(bbox, size, frequency=10000.0, block_rows=None):
    """Pallas equivalent of BBoxPositionalEncoding(size, frequency)(bbox)."""
    if size % 4 != 0:
        raise ValueError(
            f"Cannot use sin/cos positional encoding with odd dim (got dim={size})"
        )
    b = bbox.shape[0]
    bbox = bbox.astype(jnp.float32)

    # ---- wrapper-side constants (hoisted out of the kernel) -----------------
    # div_term as in the module __init__: shape (size//4,)
    div_term = jnp.exp(
        jnp.arange(0, size, 4, dtype=jnp.float32) * -(math.log(frequency) / size)
    )
    col = jnp.arange(size)
    # S[m, c] = div_term[c//4] if c % 4 == m else 0   -> bbox @ S gives the args
    s_mat = jnp.where(
        jnp.arange(4)[:, None] == (col % 4)[None, :],
        div_term[col // 4][None, :],
        0.0,
    ).astype(jnp.float32)                                          # (4, size)
    # phase[c] = 0 for even c (sin), pi/2 for odd c (cos(x) == sin(x + pi/2))
    phase = jnp.where(col % 2 == 0, 0.0, jnp.pi / 2).astype(jnp.float32)[None, :]

    # ---- lane-dense packing: k consecutive bboxes per packed row ------------
    # k * size is always a multiple of 128 (size % 4 == 0 => gcd >= 4, k <= 32),
    # so output stores are full-width vst, never masked vst.msk.
    k = 128 // math.gcd(size, 128)

    b_pad = pl.cdiv(b, k) * k
    if b_pad != b:
        bbox = jnp.pad(bbox, ((0, b_pad - b), (0, 0)))
    rows = b_pad // k
    width = k * size

    bbox_packed = bbox.reshape(rows, 4 * k)
    # Augment with a ones column / phase row: fold the +pi/2 cos offset into
    # the same MXU matmul (removes the per-element VPU add and one input ref).
    bbox_aug = jnp.concatenate(
        [bbox_packed, jnp.ones((rows, 1), jnp.float32)], axis=1
    )                                                              # (rows, 4k+1)
    s_packed = jnp.kron(jnp.eye(k, dtype=jnp.float32), s_mat)      # (4k, width)
    phase_packed = jnp.tile(phase, (1, k))                         # (1,  width)
    s_aug = jnp.concatenate([s_packed, phase_packed], axis=0)      # (4k+1, width)

    # Row block: ~4 MiB of f32 output per block (double-buffered by the
    # pipeline -> ~8 MiB peak, safe on every chip), rounded to a sublane
    # multiple.  If everything fits in one block, use the full extent.
    auto_rows = max(8, ((4 << 20) // (width * 4)) // 8 * 8)
    if block_rows is not None:
        auto_rows = min(auto_rows, max(8, block_rows // 8 * 8))
    tr = rows if rows <= auto_rows else auto_rows
    grid = (pl.cdiv(rows, tr),)

    out_packed = pl.pallas_call(
        bbox_pe_kernel,
        out_shape=jax.ShapeDtypeStruct((rows, width), jnp.float32),
        grid=grid,
        in_specs=[
            pl.BlockSpec((tr, 4 * k + 1), lambda i: (i, 0)),
            pl.BlockSpec((4 * k + 1, width), lambda i: (0, 0)),    # resident constant
        ],
        out_specs=pl.BlockSpec((tr, width), lambda i: (i, 0)),
        compiler_params=pltpu.CompilerParams(dimension_semantics=("parallel",)),
    )(bbox_aug, s_aug)

    # Unpack lane-dense rows back to (B, size) outside the kernel.
    return out_packed.reshape(b_pad, size)[:b]


def bbox_positional_encoding_ref(bbox, size, frequency=10000.0):
    """Pure-JAX reference mirroring the PyTorch forward exactly."""
    div_term = jnp.exp(
        jnp.arange(0, size, 4, dtype=jnp.float32) * -(math.log(frequency) / size)
    )
    bbox = bbox.astype(jnp.float32)
    pe = jnp.zeros((bbox.shape[0], size), jnp.float32)
    pe = pe.at[:, 0::4].set(jnp.sin(bbox[:, 0:1] * div_term))
    pe = pe.at[:, 1::4].set(jnp.cos(bbox[:, 1:2] * div_term))
    pe = pe.at[:, 2::4].set(jnp.sin(bbox[:, 2:3] * div_term))
    pe = pe.at[:, 3::4].set(jnp.cos(bbox[:, 3:4] * div_term))
    return pe


if __name__ == "__main__":
    B = 16          # batch of bboxes
    SIZE = 32       # embedding dim (must be divisible by 4)

    key = jax.random.PRNGKey(0)
    bbox = jax.random.uniform(key, (B, 4), dtype=jnp.float32) * 10.0

    out = bbox_positional_encoding(bbox, SIZE)
    out = jax.block_until_ready(out)

    ref = bbox_positional_encoding_ref(bbox, SIZE)
    assert out.shape == (B, SIZE) and out.dtype == jnp.float32
    assert jnp.allclose(out, ref, atol=1e-5, rtol=1e-5), "mismatch vs reference"

    print("KERNEL_OK")
</pallas_src>

<mosaic_0001>
module attributes {stable_mosaic.version = 11 : i64} {
  func.func @bbox_pe_kernel(%arg0: i32, %arg1: memref<4x17xf32, #tpu.memory_space<vmem>>, %arg2: memref<17x128xf32, #tpu.memory_space<vmem>>, %arg3: memref<4x128xf32, #tpu.memory_space<vmem>>) attributes {dimension_semantics = [#tpu.dimension_semantics<parallel>], iteration_bounds = array<i64: 1>, scalar_prefetch = 0 : i64, scratch_operands = 0 : i64, tpu.core_type = #tpu.core_type<tc>, window_params = [{transform_indices = @transform_0, window_bounds = array<i64: 4, 17>}, {pipeline_mode = #tpu.pipeline_mode<synchronous>, transform_indices = @transform_1, window_bounds = array<i64: 17, 128>}, {transform_indices = @transform_2, window_bounds = array<i64: 4, 128>}]} {
    %c0 = arith.constant 0 : index
    %c0_0 = arith.constant 0 : index
    %0 = vector.load %arg1[%c0, %c0_0] : memref<4x17xf32, #tpu.memory_space<vmem>>, vector<4x17xf32>
    %c0_1 = arith.constant 0 : index
    %c0_2 = arith.constant 0 : index
    %1 = vector.load %arg2[%c0_1, %c0_2] : memref<17x128xf32, #tpu.memory_space<vmem>>, vector<17x128xf32>
    %cst = arith.constant dense<0.000000e+00> : vector<4x128xf32>
    %2 = tpu.matmul %0, %1, %cst {dimension_numbers = #tpu.dot_dimension_numbers<[1], [0], [0], [1], [0, 0, 1, 1], [], []>} : vector<4x17xf32>, vector<17x128xf32>, vector<4x128xf32> -> vector<4x128xf32>
    %3 = math.sin %2 : vector<4x128xf32>
    %c0_3 = arith.constant 0 : index
    %c0_4 = arith.constant 0 : index
    %4 = vector.load %arg3[%c0_3, %c0_4] : memref<4x128xf32, #tpu.memory_space<vmem>>, vector<4x128xf32>
    tpu.vector_store %arg3[%c0_3, %c0_4], %3 {strides = array<i32>} : memref<4x128xf32, #tpu.memory_space<vmem>>, vector<4x128xf32>,
    return
  }
  func.func @transform_0(%arg0: i32) -> (i32, i32) {
    %c0_i32 = arith.constant 0 : i32
    %c0_i32_0 = arith.constant 0 : i32
    return %arg0, %c0_i32 : i32, i32
  }
  func.func @transform_1(%arg0: i32) -> (i32, i32) {
    %c0_i32 = arith.constant 0 : i32
    %c0_i32_0 = arith.constant 0 : i32
    %c0_i32_1 = arith.constant 0 : i32
    return %c0_i32, %c0_i32_0 : i32, i32
  }
  func.func @transform_2(%arg0: i32) -> (i32, i32) {
    %c0_i32 = arith.constant 0 : i32
    %c0_i32_0 = arith.constant 0 : i32
    return %arg0, %c0_i32 : i32, i32
  }
}

</mosaic_0001>

<bundles_post_ra>
// kernel: tpu_custom_call.1
= control target key start
LH: loop header
LB: loop body
LE: loop exit
PB: predicated region body
PF: predicated region fallthrough
CT: control target
= control target key end

     0   :  { %7 = vsyncpa [#allocation3], 0  ;;  %s450_s0 = inlined_call_operand.hbm [shape: f32[4,17], index: 0, kind: input, shape index: {}]   ;;  %s451_s1 = inlined_call_operand.hbm [shape: f32[17,128], index: 1, kind: input, shape index: {}]   ;;  %s452_s2 = inlined_call_operand.hbm [shape: f32[4,128], index: 2, kind: output, shape index: {}]  }
   0x1   :  { %8 = vsyncpa [#allocation6], 0 }
   0x2   :  { %9 = vsyncpa [#allocation4], 0  ;;  %s357_s9 = smov [#allocation2]   ;;  %s358_s11 = smov [#allocation5]  }
   0x3   :  { %s16_s10 = sshll.u32 %s357_s9, 4  ;;  %s25_s12 = sshll.u32 %s358_s11, 4  ;;  %s17_s10 = int_to_ptr.vmem [resolvable:$true] %s16_s10  ;;  %s386_s12 = int_to_ptr.vmem [resolvable:$true] %s25_s12 }
   0x4   :  { %s285_s15 = scalar_lea.hbm %s450_s0, 64 }
   0x5   :  { %p286_p0 = scmp.ne.s32.totalorder %s450_s0, %s285_s15  ;;  %p289_p1 = scmp.lt.u32.totalorder %s285_s15, %s450_s0 }
   0x7   :  { %p291_p2 = pnand %p289_p1, %p286_p0 }
   0x9   :  { %294 = shalt.err (!%p291_p2)
}
   0xa   :  { %s295_s20 = scalar_lea.vmem %s17_s10, 64  ;;  %p300_p4 = scmp.lt.s32.totalorder %s17_s10, %s17_s10 }
   0xb   :  { %p296_p3 = scmp.ne.s32.totalorder %s17_s10, %s295_s20  ;;  %p301_p5 = scmp.lt.s32.totalorder %s295_s20, %s295_s20 }
   0xd   :  { %p302_p6 = por %p301_p5, %p300_p4 }
   0xf   :  { %p303_p7 = pnand %p302_p6, %p296_p3 }
  0x11   :  { %306 = shalt.err (!%p303_p7)
}
  0x12   :  { %19 = dma.hbm_to_vmem [thread:$0]  %s450_s0, 64, %s17_s10, [#allocation3]  }
  0x13   :  { %s307_s25 = scalar_lea.hbm %s451_s1, 384 }
  0x14   :  { %p308_p8 = scmp.ne.s32.totalorder %s451_s1, %s307_s25  ;;  %p311_p9 = scmp.lt.u32.totalorder %s307_s25, %s451_s1 }
  0x16   :  { %p313_p10 = pnand %p311_p9, %p308_p8 }
  0x18   :  { %316 = shalt.err (!%p313_p10)
}
  0x19   :  { %s317_s30 = scalar_lea.vmem %s386_s12, 384  ;;  %p322_p12 = scmp.lt.s32.totalorder %s386_s12, %s386_s12 }
  0x1a   :  { %p318_p11 = scmp.ne.s32.totalorder %s386_s12, %s317_s30  ;;  %p323_p13 = scmp.lt.s32.totalorder %s317_s30, %s317_s30 }
  0x1c   :  { %p324_p0 = por %p323_p13, %p322_p12 }
  0x1e   :  { %p325_p1 = pnand %p324_p0, %p318_p11 }
  0x20   :  { %328 = shalt.err (!%p325_p1)
}
  0x21   :  { %s359_s0 = smov 128   ;;  %s360_s3 = smov 8  }
  0x22   :  { %31 = dma.hbm_to_vmem [thread:$0]  %s451_s1, 384, %s386_s12, [#allocation6], %s359_s0, %s359_s0, %s360_s3  }
  0x23   :  { %351 = dma.done.wait [#allocation3], 64  }
  0x24   :  { %352 = vsyncadd [#allocation3], 4294967232 }
  0x25   :  { %353 = dma.done.wait [#allocation6], 384  }
  0x26   :  { %354 = vsyncadd [#allocation6], 4294966912  ;;  %v361_v0 = vmov 0.0|0.0   ;;  %vm362_vm0 = vmmov 0   ;;  %v363_v1 = vmov 0.0   ;;  %v39_v2 = vld [vmem:[#allocation5] sm:$0xff] }
  0x27   :  { %260 = vmatprep.subr.bf16.mxu0 %v361_v0  ;;  %257 = vmatprep.mubr.msk.f32.mxu0 %vm362_vm0, %v363_v1  ;;  %v40_v3 = vld [vmem:[#allocation5 + $0x8] sm:$0xff]  ;;  %v41_v5 = vld [vmem:[#allocation5 + $0x10] sm:$0x1]  ;;  %vm46_vm1 = vcmask 1040384   ;;  %v38_v6 = vld [vmem:[#allocation2] sm:$0xf] }
  0x28   :  { %v261_v4 = vpack.c.bf16 %v40_v3, %v39_v2  ;;  %vm42_vm2 = vcmask 138240   ;;  %v364_v19 = vmov 683565275   ;;  %v365_v21 = vmov 2475754826   ;;  %s370_s1 = smov [#allocation7]  }
  0x29   :  { %v366_v24 = vmov 2131351028   ;;  %v367_v27 = vmov 2102212464   ;;  %v368_v30 = vmov 920167782  }
  0x2a   :  { %262 = vmatpush3.bf16.msra.mxu0 %v261_v4  ;;  %v369_v33 = vmov 1326507024   ;;  %s231_s6 = sshll.u32 %s370_s1, 4  ;;  %s232_s6 = int_to_ptr.vmem [resolvable:$true] %s231_s6 }
  0x2b   :  { %255 = vmatprep.subr.mxu0 %v363_v1  ;;  %s329_s7 = scalar_lea.vmem %s232_s6, 64  ;;  %p334_p3 = scmp.lt.s32.totalorder %s232_s6, %s232_s6 }
  0x2c   :  { %p330_p2 = scmp.ne.s32.totalorder %s232_s6, %s329_s7  ;;  %p335_p4 = scmp.lt.s32.totalorder %s329_s7, %s329_s7 }
  0x2e   :  { %256 = vmatpush3.msk.msra.mxu0 %vm46_vm1, %v41_v5  ;;  %p336_p5 = por %p335_p4, %p334_p3 }
  0x2f   :  { %258 = vmatmul.mubr.msk.f32.vlgmr.msra.gmra.mrb[0].mxu0 %vm42_vm2, %v38_v6 }
  0x30   :  { %p337_p6 = pnand %p336_p5, %p330_p2 }
 0x102   :  { %v417_v7 = vpop.f32.mrb[0].mxu0 }
 0x103   :  { %v123_v8 = vand.u32 2139095040, %v417_v7  ;;  %v259_v9 = vpop.f32.mrb[1].mxu0  ;;  %v120_v13 = vand.u32 2147483647, %v417_v7  ;;  %vm122_vm10 = vcmp.lt.s32.totalorder %v417_v7, 0  ;;  %vm212_vm15 = vweird.f32 %v417_v7 }
 0x105   :  { %v124_v10 = vshrl.u32 %v123_v8, 23  ;;  %v127_v16 = vand.u32 8388607, %v120_v13  ;;  %vm121_vm11 = vcmp.le.f32.partialorder %v120_v13, 0.7853982 }
 0x107   :  { %v243_v11 = vadd.s32 4294967169, %v124_v10  ;;  %v128_v35 = vor.u32 8388608, %v127_v16 }
 0x109   :  { %v130_v12 = vadd.s32 1, %v243_v11  ;;  %v168_v49 = vshll.u32 %v128_v35, 8 }
 0x10b   :  { %vm131_vm3 = vcmp.gt.s32.totalorder %v130_v12, 0 }
 0x10c   :  { %v132_v14 = vsel %vm131_vm3, %v130_v12, 0 }
 0x10d   :  { %v134_v15 = vand.u32 31, %v132_v14  ;;  %v133_v18 = vshrl.u32 %v132_v14, 5 }
 0x10f   :  { %v135_v17 = vsub.s32 32, %v134_v15  ;;  %v137_v20 = vshll.u32 %v364_v19, %v134_v15  ;;  %v140_v22 = vshll.u32 %v365_v21, %v134_v15  ;;  %v143_v26 = vshll.u32 %v366_v24, %v134_v15 }
 0x110   :  { %v146_v29 = vshll.u32 %v367_v27, %v134_v15  ;;  %v149_v32 = vshll.u32 %v368_v30, %v134_v15  ;;  %vm152_vm4 = vcmp.lt.s32.totalorder %v133_v18, 1  ;;  %vm155_vm5 = vcmp.lt.s32.totalorder %v133_v18, 4 }
 0x111   :  { %v138_v23 = vshrl.u32 %v365_v21, %v135_v17  ;;  %v141_v25 = vshrl.u32 %v366_v24, %v135_v17  ;;  %v144_v28 = vshrl.u32 %v367_v27, %v135_v17  ;;  %v147_v31 = vshrl.u32 %v368_v30, %v135_v17 }
 0x112   :  { %v150_v34 = vshrl.u32 %v369_v33, %v135_v17  ;;  %v136_v44 = vshrl.u32 %v364_v19, %v135_v17  ;;  %vm154_vm6 = vcmp.lt.s32.totalorder %v133_v18, 3  ;;  %vm153_vm7 = vcmp.lt.s32.totalorder %v133_v18, 2 }
 0x113   :  { %v139_v36 = vor.u32 %v138_v23, %v137_v20  ;;  %v142_v37 = vor.u32 %v141_v25, %v140_v22  ;;  %v145_v38 = vor.u32 %v144_v28, %v143_v26  ;;  %v148_v39 = vor.u32 %v147_v31, %v146_v29 }
 0x114   :  { %v151_v40 = vor.u32 %v150_v34, %v149_v32 }
 0x115   :  { %v157_v41 = vsel %vm155_vm5, %v145_v38, 2102212464  ;;  %v160_v42 = vsel %vm152_vm4, %v139_v36, %v142_v37  ;;  %v164_v43 = vsel %vm152_vm4, %v142_v37, %v145_v38  ;;  %v161_v45 = vsel %vm155_vm5, %v148_v39, 920167782 }
 0x116   :  { %v165_v46 = vsel %vm155_vm5, %v151_v40, 1326507024  ;;  %v162_v47 = vsel %vm154_vm6, %v145_v38, %v161_v45  ;;  %v156_v50 = vsel %vm152_vm4, %v136_v44, %v139_v36  ;;  %v158_v51 = vsel %vm154_vm6, %v142_v37, %v157_v41 }
 0x117   :  { %v166_v48 = vsel %vm154_vm6, %v148_v39, %v165_v46  ;;  %v163_v52 = vsel %vm153_vm7, %v160_v42, %v162_v47  ;;  %v159_v58 = vsel %vm153_vm7, %v156_v50, %v158_v51 }
 0x118   :  { %v167_v53 = vsel %vm153_vm7, %v164_v43, %v166_v48  ;;  %v426_v56 = vmul.u32.u64.low %v168_v49, %v163_v52  ;;  %v427_v57 = vmul.u32.u64.high %v168_v49, %v163_v52, %v426_v56  ;;  %v175_v60 = vmul.u32 %v168_v49, %v159_v58 }
 0x119   :  { %v423_v54 = vmul.u32.u64.low %v168_v49, %v167_v53  ;;  %v424_v55 = vmul.u32.u64.high %v168_v49, %v167_v53, %v423_v54 }
 0x11a   :  { %v178_v59 = vadd.s32 1, %v427_v57 }
 0x11b   :  { %vm177_vm8 = vc.u32 %v424_v55, %v426_v56  ;;  %v176_v9 = vadd.s32 %v426_v56, %v424_v55 }
 0x11c   :  { %v179_v61 = vsel %vm177_vm8, %v178_v59, %v427_v57 }
 0x11d   :  { %v180_v62 = vadd.s32 %v179_v61, %v175_v60 }
 0x11f   :  { %v181_v63 = vadd.s32 536870912, %v180_v62 }
 0x121   :  { %v182_v0 = vshrl.u32 %v181_v63, 30 }
 0x123   :  { %v183_v1 = vshll.u32 %v182_v0, 30  ;;  %v206_v22 = vsub.s32 4, %v182_v0 }
 0x125   :  { %v184_v2 = vsub.s32 %v180_v62, %v183_v1  ;;  %v207_v25 = vsel %vm122_vm10, %v206_v22, %v182_v0 }
 0x126   :  { %v209_v27 = vsel %vm121_vm11, 0, %v207_v25 }
 0x127   :  { %v186_v3 = vsub.s32 0, %v184_v2  ;;  %v213_v28 = vadd.s32 3, %v209_v27 }
 0x129   :  { %v244_v4 = vmin.u32 %v186_v3, %v184_v2  ;;  %v214_v29 = vand.u32 3, %v213_v28 }
 0x12b   :  { %v188_v5 = vclz %v244_v4  ;;  %vm219_vm12 = vcmp.eq.s32.totalorder %v214_v29, 2  ;;  %vm216_vm13 = vcmp.eq.s32.totalorder %v214_v29, 0  ;;  %vm215_vm14 = vcmp.lt.s32.totalorder %v214_v29, 2 }
 0x12d   :  { %v245_v6 = vadd.s32 4294967294, %v188_v5 }
 0x12f   :  { %vm246_vm9 = vcmp.lt.s32.totalorder %v245_v6, 0 }
 0x130   :  { %v191_v8 = vsel %vm246_vm9, 0, %v245_v6 }
 0x131   :  { %v192_v10 = vsub.s32 32, %v191_v8  ;;  %v196_v11 = vsub.s32 4294967266, %v191_v8  ;;  %v193_v12 = vshll.u32 %v184_v2, %v191_v8 }
 0x133   :  { %v194_v14 = vshrl.u32 %v176_v9, %v192_v10  ;;  %v197_v15 = vadd.s32 127, %v196_v11 }
 0x135   :  { %v195_v16 = vor.u32 %v194_v14, %v193_v12  ;;  %v198_v17 = vshll.u32 %v197_v15, 23 }
 0x137   :  { %v199_v18 = vor.u32 4788187, %v198_v17  ;;  %v202_v20 = vcvt.s32.f32 %v195_v16 }
 0x139   :  { %v200_v19 = vand.u32 2147483647, %v199_v18 }
 0x13b   :  { %v203_v21 = vmul.f32 %v202_v20, %v200_v19 }
 0x13d   :  { %v204_v23 = vxor.u32 2147483648, %v203_v21 }
 0x13f   :  { %v205_v24 = vsel %vm122_vm10, %v204_v23, %v203_v21 }
 0x140   :  { %v208_v26 = vsel %vm121_vm11, %v417_v7, %v205_v24 }
 0x141   :  { %281 = vcosq.f32 %v208_v26 }
 0x142   :  { %283 = vsinq.f32 %v208_v26 }
 0x14b   :  { %v282_v30 = vpop.eup %281 }
 0x14c   :  { %v284_v31 = vpop.eup %283  ;;  %v220_v32 = vxor.u32 2147483648, %v282_v30 }
 0x14d   :  { %v217_v33 = vxor.u32 2147483648, %v284_v31 }
 0x14e   :  { %v221_v34 = vsel %vm219_vm12, %v220_v32, %v284_v31 }
 0x14f   :  { %v218_v13 = vsel %vm216_vm13, %v282_v30, %v217_v33 }
 0x150   :  { %v222_v35 = vsel %vm215_vm14, %v218_v13, %v221_v34 }
 0x151   :  { %v223_v36 = vsel %vm212_vm15, nan, %v222_v35 }
 0x152   :  { %224 = vst [vmem:[#allocation7] sm:$0xf] %v223_v36 }
 0x153   :  { %340 = shalt.err (!%p337_p6)
}
 0x154   :  { %s341_s10 = scalar_lea.hbm %s452_s2, 64 }
 0x155   :  { %p342_p7 = scmp.ne.s32.totalorder %s452_s2, %s341_s10  ;;  %p345_p8 = scmp.lt.u32.totalorder %s341_s10, %s452_s2 }
 0x157   :  { %p347_p9 = pnand %p345_p8, %p342_p7 }
 0x159   :  { %350 = shalt.err (!%p347_p9)
}
 0x15a   :  { %234 = dma.vmem_to_hbm [thread:$0]  %s232_s6, 64, %s452_s2, [#allocation4]  }
 0x15b   :  { %355 = dma.done.wait [#allocation4], 64  }
 0x15c   :  { %356 = vsyncadd [#allocation4], 4294967232 }
 0x15d   :  { %238 = vsyncpa [#allocation3], 1 }
 0x15e   :  { %239 = vsyncpa [#allocation6], 1 }
 0x15f   :  { %240 = vsyncpa [#allocation4], 1 }

</bundles_post_ra>
